<compile_context>
chip_gen: v7x
topology: tpu7x:2x2x1
jax: 0.10.0
libtpu: 0.0.40
codegen_flags: <defaults>
</compile_context>

<pallas_src>
import functools

import jax
import jax.numpy as jnp
from jax.experimental import pallas as pl
from jax.experimental.pallas import tpu as pltpu

MAX_STATE_DIM = 6
_LANES = 128
_VMEM_BUDGET = 20 * 1024 * 1024      # target per-step working set for tiling
_VMEM_LIMIT = 48 * 1024 * 1024       # requested scoped VMEM (< v7x 64 MiB)


def _mlp_kernel(use_bf16_mxu, xT_ref, w1_ref, b1_ref, w2_ref, b2_ref,
                w3_ref, b3_ref, o_ref):
    # xT: (6, TB)   w1: (H, 6)  b1: (H, 1)   w2: (H, H)  b2: (H, 1)
    # w3: (H, 1)    b3: (1, 1)  o : (1, TB)
    xT = xT_ref[...]

    # Layer 1: Linear(6 -> H) on the MXU (K=6, negligible cost there; frees
    # the VPU from 6 broadcast FMA chains per tile), batch on lanes.
    h1 = jnp.dot(w1_ref[...], xT, preferred_element_type=jnp.float32)
    h1 = jnp.maximum(h1 + b1_ref[...], 0.0)                     # (H, TB)

    # Layer 2: Linear(H -> H) on the MXU.  bf16 operands with an f32
    # accumulator avoid the multi-pass f32 MXU lowering; bf16 never touches
    # the VPU, so this is safe on v5e as well.
    if use_bf16_mxu:
        h2 = jnp.dot(w2_ref[...].astype(jnp.bfloat16),
                     h1.astype(jnp.bfloat16),
                     preferred_element_type=jnp.float32)
    else:
        h2 = jnp.dot(w2_ref[...], h1, preferred_element_type=jnp.float32)
    h2 = jnp.maximum(h2 + b2_ref[...], 0.0)                     # (H, TB)

    # Layer 3: Linear(H -> 1) as a VPU multiply + sublane (XLU) reduction;
    # lane-dense (1, TB) store instead of masked (TB, 1) single-lane stores.
    o_ref[...] = (jnp.sum(w3_ref[...] * h2, axis=0, keepdims=True)
                  + b3_ref[...])


def _pick_tile(batch, hidden):
    """Pick batch tile TB (multiple of 128) and padded batch B_pad."""
    b128 = max(_LANES, ((batch + _LANES - 1) // _LANES) * _LANES)

    # Rough per-TB-column VMEM bytes: double-buffered xT and out blocks
    # (8 sublanes each once padded) plus f32 h1/h2 and their bf16 MXU copies.
    per_col = 2 * 8 * 4 + 2 * 8 * 4 + 12 * hidden
    weight_bytes = 4 * (hidden * MAX_STATE_DIM + hidden * hidden
                        + 4 * hidden + 8)
    tb_vmem = max(_LANES,
                  ((_VMEM_BUDGET - weight_bytes) // per_col)
                  // _LANES * _LANES)

    # Small H -> very cheap per-row compute: let TB grow to amortize the
    # per-grid-step overhead and keep long unmasked lane-dense store runs.
    tb_max = 16384 if hidden <= 128 else (8192 if hidden <= 512 else 2048)

    tb = max(_LANES, min(tb_max, tb_vmem, b128))

    # v7x megacore: ensure the "parallel" grid has >= 2 steps whenever the
    # batch is big enough to split across the two TensorCores.
    if b128 // tb < 2 and b128 >= 2 * _LANES:
        tb = max(_LANES, (tb // 2) // _LANES * _LANES)

    b_pad = ((b128 + tb - 1) // tb) * tb
    return tb, b_pad


def unified_value_network(x, params, *, use_bf16_mxu=True):
    """MLP critic forward in one tiled Pallas kernel.

    x: (B, MAX_STATE_DIM) float32
    params: w1 (H,6), b1 (H,1), w2 (H,H), b2 (H,1), w3 (H,1), b3 (1,1)
    returns: (B, 1) float32
    """
    x = x.astype(jnp.float32)
    B = x.shape[0]
    H = params["w1"].shape[0]
    TB, B_pad = _pick_tile(B, H)

    # Batch-on-lanes input: single fused transpose+pad expression (no full
    # zero-fill + scatter pass over HBM).
    xT = jnp.pad(x.T, ((0, 0), (0, B_pad - B)))                 # (6, B_pad)

    const = lambda i: (0, 0)
    # Weights/biases: constant-index single block, VMEM-resident for the whole
    # grid; single-buffered so w2 does not cost 2 * 4 * H^2 bytes of VMEM.
    wspec = lambda shape: pl.BlockSpec(shape, const,
                                       pipeline_mode=pl.Buffered(1))

    out = pl.pallas_call(
        functools.partial(_mlp_kernel, use_bf16_mxu),
        out_shape=jax.ShapeDtypeStruct((1, B_pad), jnp.float32),
        grid=(B_pad // TB,),
        in_specs=[
            pl.BlockSpec((MAX_STATE_DIM, TB), lambda i: (0, i)),   # xT tile
            wspec((H, MAX_STATE_DIM)),                             # w1
            wspec((H, 1)),                                         # b1
            wspec((H, H)),                                         # w2
            wspec((H, 1)),                                         # b2
            wspec((H, 1)),                                         # w3
            wspec((1, 1)),                                         # b3
        ],
        out_specs=pl.BlockSpec((1, TB), lambda i: (0, i)),
        compiler_params=pltpu.CompilerParams(
            dimension_semantics=("parallel",),
            vmem_limit_bytes=_VMEM_LIMIT,
        ),
    )(xT, params["w1"], params["b1"], params["w2"], params["b2"],
      params["w3"], params["b3"])

    # NOTE: padded batch lanes hold garbage (relu(b1)-derived); they must be
    # sliced off before any reduction over the raw kernel output.
    return out[:, :B].reshape(B, 1)


def init_params(key, hidden_dim):
    """PyTorch nn.Linear default init: U(-1/sqrt(fan_in), 1/sqrt(fan_in)).
    Weights are PyTorch-native (out_features, in_features); biases are column
    vectors (out_features, 1) for lane-broadcast inside the kernel."""
    ks = jax.random.split(key, 6)

    def linear(kw, kb, fan_in, fan_out):
        bound = 1.0 / jnp.sqrt(jnp.float32(fan_in))
        w = jax.random.uniform(kw, (fan_out, fan_in), jnp.float32, -bound, bound)
        b = jax.random.uniform(kb, (fan_out, 1), jnp.float32, -bound, bound)
        return w, b

    w1, b1 = linear(ks[0], ks[1], MAX_STATE_DIM, hidden_dim)
    w2, b2 = linear(ks[2], ks[3], hidden_dim, hidden_dim)
    w3, b3 = linear(ks[4], ks[5], hidden_dim, 1)
    # store w3 as an (H, 1) column for the in-kernel sublane reduction
    return {"w1": w1, "b1": b1, "w2": w2, "b2": b2, "w3": w3.T, "b3": b3}


def reference_forward(x, p):
    h1 = jnp.maximum(x @ p["w1"].T + p["b1"].T, 0.0)
    h2 = jnp.maximum(h1 @ p["w2"].T + p["b2"].T, 0.0)
    return h2 @ p["w3"] + p["b3"]


if __name__ == "__main__":
    key = jax.random.PRNGKey(0)
    k_params, k_x = jax.random.split(key)

    hidden_dim = 32
    batch = 8

    params = init_params(k_params, hidden_dim)
    x = jax.random.normal(k_x, (batch, MAX_STATE_DIM), jnp.float32)

    ref = reference_forward(x, params)

    # Exact-semantics path (f32 MXU operands): tight tolerance.
    out_f32 = jax.block_until_ready(
        unified_value_network(x, params, use_bf16_mxu=False))
    assert out_f32.shape == (batch, 1), out_f32.shape
    assert jnp.allclose(out_f32, ref, atol=2e-5, rtol=2e-5), (out_f32, ref)

    # Performance-default path (bf16 layer-2 MXU operands): relaxed tolerance.
    out_bf16 = jax.block_until_ready(
        unified_value_network(x, params, use_bf16_mxu=True))
    assert out_bf16.shape == (batch, 1), out_bf16.shape
    assert jnp.allclose(out_bf16, ref, atol=2e-2, rtol=2e-2), (out_bf16, ref)

    print("KERNEL_OK")
</pallas_src>

<mosaic_0001>
module attributes {stable_mosaic.version = 11 : i64} {
  func.func @_mlp_kernel(%arg0: i32, %arg1: memref<6x128xf32, #tpu.memory_space<vmem>>, %arg2: memref<32x6xf32, #tpu.memory_space<vmem>>, %arg3: memref<32x1xf32, #tpu.memory_space<vmem>>, %arg4: memref<32x32xf32, #tpu.memory_space<vmem>>, %arg5: memref<32x1xf32, #tpu.memory_space<vmem>>, %arg6: memref<32x1xf32, #tpu.memory_space<vmem>>, %arg7: memref<1x1xf32, #tpu.memory_space<vmem>>, %arg8: memref<1x128xf32, #tpu.memory_space<vmem>>) attributes {dimension_semantics = [#tpu.dimension_semantics<parallel>], iteration_bounds = array<i64: 1>, scalar_prefetch = 0 : i64, scratch_operands = 0 : i64, tpu.core_type = #tpu.core_type<tc>, window_params = [{transform_indices = @transform_0, window_bounds = array<i64: 6, 128>}, {pipeline_mode = #tpu.pipeline_mode<synchronous>, transform_indices = @transform_1, window_bounds = array<i64: 32, 6>}, {pipeline_mode = #tpu.pipeline_mode<synchronous>, transform_indices = @transform_2, window_bounds = array<i64: 32, 1>}, {pipeline_mode = #tpu.pipeline_mode<synchronous>, transform_indices = @transform_3, window_bounds = array<i64: 32, 32>}, {pipeline_mode = #tpu.pipeline_mode<synchronous>, transform_indices = @transform_4, window_bounds = array<i64: 32, 1>}, {pipeline_mode = #tpu.pipeline_mode<synchronous>, transform_indices = @transform_5, window_bounds = array<i64: 32, 1>}, {pipeline_mode = #tpu.pipeline_mode<synchronous>, transform_indices = @transform_6, window_bounds = array<i64: 1, 1>}, {transform_indices = @transform_7, window_bounds = array<i64: 1, 128>}]} {
    %c0 = arith.constant 0 : index
    %c0_0 = arith.constant 0 : index
    %0 = vector.load %arg1[%c0, %c0_0] : memref<6x128xf32, #tpu.memory_space<vmem>>, vector<6x128xf32>
    %c0_1 = arith.constant 0 : index
    %c0_2 = arith.constant 0 : index
    %1 = vector.load %arg2[%c0_1, %c0_2] : memref<32x6xf32, #tpu.memory_space<vmem>>, vector<32x6xf32>
    %cst = arith.constant dense<0.000000e+00> : vector<32x128xf32>
    %2 = tpu.matmul %1, %0, %cst {dimension_numbers = #tpu.dot_dimension_numbers<[1], [0], [0], [1], [0, 0, 1, 1], [], []>} : vector<32x6xf32>, vector<6x128xf32>, vector<32x128xf32> -> vector<32x128xf32>
    %c0_3 = arith.constant 0 : index
    %c0_4 = arith.constant 0 : index
    %3 = vector.load %arg3[%c0_3, %c0_4] : memref<32x1xf32, #tpu.memory_space<vmem>>, vector<32x1xf32>
    %4 = vector.broadcast %3 : vector<32x1xf32> to vector<32x128xf32>
    %5 = arith.addf %2, %4 : vector<32x128xf32>
    %cst_5 = arith.constant 0.000000e+00 : f32
    %6 = vector.broadcast %cst_5 : f32 to vector<32x128xf32>
    %7 = arith.maximumf %5, %6 : vector<32x128xf32>
    %c0_6 = arith.constant 0 : index
    %c0_7 = arith.constant 0 : index
    %8 = vector.load %arg4[%c0_6, %c0_7] : memref<32x32xf32, #tpu.memory_space<vmem>>, vector<32x32xf32>
    %cst_8 = arith.constant dense<0.000000e+00> : vector<32x128xf32>
    %9 = tpu.matmul %8, %7, %cst_8 {dimension_numbers = #tpu.dot_dimension_numbers<[1], [0], [0], [1], [0, 0, 1, 1], [], []>} : vector<32x32xf32>, vector<32x128xf32>, vector<32x128xf32> -> vector<32x128xf32>
    %c0_9 = arith.constant 0 : index
    %c0_10 = arith.constant 0 : index
    %10 = vector.load %arg5[%c0_9, %c0_10] : memref<32x1xf32, #tpu.memory_space<vmem>>, vector<32x1xf32>
    %11 = vector.broadcast %10 : vector<32x1xf32> to vector<32x128xf32>
    %12 = arith.addf %9, %11 : vector<32x128xf32>
    %cst_11 = arith.constant 0.000000e+00 : f32
    %13 = vector.broadcast %cst_11 : f32 to vector<32x128xf32>
    %14 = arith.maximumf %12, %13 : vector<32x128xf32>
    %c0_12 = arith.constant 0 : index
    %c0_13 = arith.constant 0 : index
    %15 = vector.load %arg6[%c0_12, %c0_13] : memref<32x1xf32, #tpu.memory_space<vmem>>, vector<32x1xf32>
    %16 = vector.broadcast %15 : vector<32x1xf32> to vector<32x128xf32>
    %17 = arith.mulf %16, %14 : vector<32x128xf32>
    %cst_14 = arith.constant dense<0.000000e+00> : vector<128xf32>
    %18 = vector.multi_reduction <add>, %17, %cst_14 [0] : vector<32x128xf32> to vector<128xf32>
    %19 = vector.shape_cast %18 : vector<128xf32> to vector<1x128xf32>
    %c0_15 = arith.constant 0 : index
    %c0_16 = arith.constant 0 : index
    %20 = vector.load %arg7[%c0_15, %c0_16] : memref<1x1xf32, #tpu.memory_space<vmem>>, vector<1x1xf32>
    %21 = vector.broadcast %20 : vector<1x1xf32> to vector<1x128xf32>
    %22 = arith.addf %19, %21 : vector<1x128xf32>
    %c0_17 = arith.constant 0 : index
    %c0_18 = arith.constant 0 : index
    %23 = vector.load %arg8[%c0_17, %c0_18] : memref<1x128xf32, #tpu.memory_space<vmem>>, vector<1x128xf32>
    tpu.vector_store %arg8[%c0_17, %c0_18], %22 {strides = array<i32>} : memref<1x128xf32, #tpu.memory_space<vmem>>, vector<1x128xf32>,
    return
  }
  func.func @transform_0(%arg0: i32) -> (i32, i32) {
    %c0_i32 = arith.constant 0 : i32
    %c0_i32_0 = arith.constant 0 : i32
    return %c0_i32, %arg0 : i32, i32
  }
  func.func @transform_1(%arg0: i32) -> (i32, i32) {
    %c0_i32 = arith.constant 0 : i32
    %c0_i32_0 = arith.constant 0 : i32
    %c0_i32_1 = arith.constant 0 : i32
    return %c0_i32, %c0_i32_0 : i32, i32
  }
  func.func @transform_2(%arg0: i32) -> (i32, i32) {
    %c0_i32 = arith.constant 0 : i32
    %c0_i32_0 = arith.constant 0 : i32
    %c0_i32_1 = arith.constant 0 : i32
    return %c0_i32, %c0_i32_0 : i32, i32
  }
  func.func @transform_3(%arg0: i32) -> (i32, i32) {
    %c0_i32 = arith.constant 0 : i32
    %c0_i32_0 = arith.constant 0 : i32
    %c0_i32_1 = arith.constant 0 : i32
    return %c0_i32, %c0_i32_0 : i32, i32
  }
  func.func @transform_4(%arg0: i32) -> (i32, i32) {
    %c0_i32 = arith.constant 0 : i32
    %c0_i32_0 = arith.constant 0 : i32
    %c0_i32_1 = arith.constant 0 : i32
    return %c0_i32, %c0_i32_0 : i32, i32
  }
  func.func @transform_5(%arg0: i32) -> (i32, i32) {
    %c0_i32 = arith.constant 0 : i32
    %c0_i32_0 = arith.constant 0 : i32
    %c0_i32_1 = arith.constant 0 : i32
    return %c0_i32, %c0_i32_0 : i32, i32
  }
  func.func @transform_6(%arg0: i32) -> (i32, i32) {
    %c0_i32 = arith.constant 0 : i32
    %c0_i32_0 = arith.constant 0 : i32
    %c0_i32_1 = arith.constant 0 : i32
    return %c0_i32, %c0_i32_0 : i32, i32
  }
  func.func @transform_7(%arg0: i32) -> (i32, i32) {
    %c0_i32 = arith.constant 0 : i32
    %c0_i32_0 = arith.constant 0 : i32
    return %c0_i32, %arg0 : i32, i32
  }
}

</mosaic_0001>

<bundles_post_ra>
// kernel: tpu_custom_call.1
= control target key start
LH: loop header
LB: loop body
LE: loop exit
PB: predicated region body
PF: predicated region fallthrough
CT: control target
= control target key end

     0   :  { %s569_s0 = inlined_call_operand.vmem [shape: f32[6,128], index: 0, kind: input, shape index: {}]   ;;  %s570_s1 = inlined_call_operand.vmem [shape: f32[32,6], index: 1, kind: input, shape index: {}]   ;;  %s571_s2 = inlined_call_operand.vmem [shape: f32[32,1], index: 2, kind: input, shape index: {}]   ;;  %s572_s3 = inlined_call_operand.vmem [shape: f32[32,32], index: 3, kind: input, shape index: {}]   ;;  %s573_s4 = inlined_call_operand.vmem [shape: f32[32,1], index: 4, kind: input, shape index: {}]   ;;  %s574_s5 = inlined_call_operand.vmem [shape: f32[32,1], index: 5, kind: input, shape index: {}]   ;;  %s575_s6 = inlined_call_operand.<no memory space> [shape: f32[1,1], index: 6, kind: input, shape index: {}]   ;;  %s576_s7 = inlined_call_operand.hbm [shape: f32[1,128], index: 7, kind: output, shape index: {}]  }
   0x1   :  { %v12_v0 = vstv %s575_s6 }
   0x2   :  { %13 = vst [vmem:[#allocation2] sm:$0x1] %v12_v0 }
   0x3   :  { %v29_v1 = vld [vmem:[%s569_s0] sm:$0x3f]  ;;  %vm71_vm0 = vcmask 1045504   ;;  %vm58_vm1 = vcmask 48128   ;;  %v31_v3 = vld [vmem:[%s570_s1 + $0x8] sm:$0xff]  ;;  %v32_v4 = vld [vmem:[%s570_s1 + $0x10] sm:$0xff] }
   0x4   :  { %v30_v2 = vld [vmem:[%s570_s1] sm:$0xff]  ;;  %379 = vmatprep.subr.msk.mxu0 %vm71_vm0, %v29_v1  ;;  %v441_v6 = vmov 0   ;;  %v36_v7 = vld [vmem:[%s571_s2 + $0x10] sm:$0xff]  ;;  %v33_v8 = vld [vmem:[%s570_s1 + $0x18] sm:$0xff] }
   0x5   :  { %381 = vmatprep.mubr.msk.f32.mxu0 %vm58_vm1, %v30_v2  ;;  %v34_v5 = vld [vmem:[%s571_s2] sm:$0xff]  ;;  %380 = vmatpush3.msk.msra.mxu0 %vm71_vm0, %v29_v1  ;;  %v35_v9 = vld [vmem:[%s571_s2 + $0x8] sm:$0xff]  ;;  %v37_v10 = vld [vmem:[%s571_s2 + $0x18] sm:$0xff] }
   0x6   :  { %415 = vset.pattern.permute.xlu0 %v441_v6  ;;  %382 = vmatmul.mubr.msk.f32.vlgmr.msra.gmra.mrb[0].mxu0 %vm58_vm1, %v31_v3 }
   0x7   :  { %40 = vperm.xlu0 %415, %v34_v5   ;;  %384 = vmatprep.mubr.msk.f32.mxu0 %vm58_vm1, %v32_v4 }
   0x8   :  { %416 = vset.pattern.permute.xlu1 %v441_v6 }
   0x9   :  { %50 = vperm.xlu1 %416, %v36_v7  }
   0xa   :  { %14 = vsyncpa [#allocation4], 0  ;;  %385 = vmatmul.mubr.msk.f32.gmra.mrb[2].mxu0 %vm58_vm1, %v33_v8  ;;  %v168_v11 = vld [vmem:[%s573_s4] sm:$0xff]  ;;  %v169_v12 = vld [vmem:[%s573_s4 + $0x8] sm:$0xff]  ;;  %vm192_vm2 = vcmask 261120   ;;  %v337_v4 = vlaneseq }
   0xb   :  { %45 = vperm.xlu0 %415, %v35_v9   ;;  %v170_v13 = vld [vmem:[%s573_s4 + $0x10] sm:$0xff]  ;;  %v171_v14 = vld [vmem:[%s573_s4 + $0x18] sm:$0xff]  ;;  %v294_v15 = vld [vmem:[%s574_s5] sm:$0xff] }
   0xc   :  { %v295_v16 = vld [vmem:[%s574_s5 + $0x8] sm:$0xff]  ;;  %v296_v17 = vld [vmem:[%s574_s5 + $0x10] sm:$0xff]  ;;  %v297_v18 = vld [vmem:[%s574_s5 + $0x18] sm:$0xff]  ;;  %v338_v7 = vshrl.u32 %v337_v4, 7 }
   0xd   :  { %55 = vperm.xlu1 %416, %v37_v10   ;;  %v331_v19 = vld [vmem:[#allocation2] sm:$0x1]  ;;  %v166_v21 = vld [vmem:[%s572_s3 + $0x10] sm:$0xff]  ;;  %v165_v40 = vld [vmem:[%s572_s3 + $0x8] sm:$0xff] }
   0xe   :  { %v164_v20 = vld [vmem:[%s572_s3] sm:$0xff]  ;;  %398 = vmatprep.mubr.msk.f32.mxu1 %vm192_vm2, %v166_v21  ;;  %v167_v41 = vld [vmem:[%s572_s3 + $0x18] sm:$0xff]  ;;  %v339_v10 = vsub.s32 0, %v338_v7  ;;  %s442_s3 = smov [#allocation3]  }
   0xf   :  { %174 = vperm.xlu0 %415, %v168_v11   ;;  %395 = vmatprep.mubr.msk.f32.mxu0 %vm192_vm2, %v164_v20  ;;  %s349_s14 = sshll.u32 %s442_s3, 4  ;;  %s350_s14 = int_to_ptr.vmem [resolvable:$true] %s349_s14 }
  0x10   :  { %s417_s15 = scalar_lea.vmem %s350_s14, 16  ;;  %s421_s16 = scalar_lea.vmem %s350_s14, 32 }
  0x11   :  { %179 = vperm.xlu1 %416, %v169_v12   ;;  %p418_p0 = scmp.ne.s32.totalorder %s350_s14, %s417_s15  ;;  %p422_p1 = scmp.lt.s32.totalorder %s350_s14, %s350_s14 }
  0x12   :  { %p423_p2 = scmp.lt.s32.totalorder %s421_s16, %s417_s15 }
  0x13   :  { %184 = vperm.xlu0 %415, %v170_v13  }
  0x14   :  { %p424_p3 = por %p423_p2, %p422_p1 }
  0x15   :  { %189 = vperm.xlu1 %416, %v171_v14  }
  0x16   :  { %p425_p4 = pnand %p424_p3, %p418_p0 }
  0x17   :  { %300 = vperm.xlu0 %415, %v294_v15  }
  0x19   :  { %305 = vperm.xlu1 %416, %v295_v16  }
  0x1b   :  { %310 = vperm.xlu0 %415, %v296_v17  }
  0x1d   :  { %315 = vperm.xlu1 %416, %v297_v18  }
  0x1f   :  { %334 = vperm.xlu0 %415, %v331_v19  }
  0x86   :  { %v41_v22 = vpop.permute.xlu0 %40 }
  0x88   :  { %v51_v23 = vpop.permute.xlu1 %50 }
  0x8a   :  { %v46_v24 = vpop.permute.xlu0 %45 }
  0x8c   :  { %v56_v30 = vpop.permute.xlu1 %55 }
  0x8e   :  { %v175_v42 = vpop.permute.xlu0 %174 }
  0x90   :  { %v180_v43 = vpop.permute.xlu1 %179 }
  0x92   :  { %v185_v44 = vpop.permute.xlu0 %184 }
  0x94   :  { %v190_v45 = vpop.permute.xlu1 %189 }
  0x96   :  { %v301_v46 = vpop.permute.xlu0 %300 }
  0x98   :  { %v306_v55 = vpop.permute.xlu1 %305 }
  0x9a   :  { %v311_v62 = vpop.permute.xlu0 %310 }
  0x9c   :  { %v316_v1 = vpop.permute.xlu1 %315 }
  0x9e   :  { %v335_v12 = vpop.permute.xlu0 %334 }
  0x9f   :  { %v340_v14 = vrot.slane %v335_v12, %v339_v10 }
  0xd9   :  { %v383_v25 = vpop.f32.mrb[0].mxu0 }
  0xda   :  { %v147_v26 = vadd.f32 %v383_v25, %v46_v24  ;;  %v141_v27 = vpop.f32.mrb[1].mxu0 }
  0xdb   :  { %v142_v28 = vadd.f32 %v141_v27, %v41_v22 }
  0xdc   :  { %v161_v29 = vmax.f32 %v147_v26, 0.0 }
  0xdd   :  { %v160_v31 = vmax.f32 %v142_v28, 0.0  ;;  %v386_v32 = vpop.f32.mrb[2].mxu0 }
  0xde   :  { %v157_v33 = vadd.f32 %v386_v32, %v56_v30  ;;  %v151_v34 = vpop.f32.mrb[3].mxu0 }
  0xdf   :  { %v401_v35 = vpack.c.bf16 %v161_v29, %v160_v31  ;;  %v152_v36 = vadd.f32 %v151_v34, %v51_v23 }
  0xe0   :  { %v163_v37 = vmax.f32 %v157_v33, 0.0 }
  0xe1   :  { %v162_v38 = vmax.f32 %v152_v36, 0.0  ;;  %402 = vmatprep.subr.bf16.mxu0 %v401_v35  ;;  %409 = vmatprep.subr.bf16.mxu1 %v401_v35 }
  0xe2   :  { %404 = vmatpush3.bf16.msra.mxu0 %v401_v35  ;;  %411 = vmatpush3.bf16.msra.mxu1 %v401_v35 }
  0xe3   :  { %v405_v39 = vpack.c.bf16 %v163_v37, %v162_v38 }
  0xe5   :  { %406 = vmatprep.subr.bf16.mxu0 %v405_v39  ;;  %410 = vmatprep.subr.bf16.mxu1 %v405_v39 }
  0xe6   :  { %408 = vmatpush3.bf16.msra.mxu0 %v405_v39  ;;  %412 = vmatpush3.bf16.msra.mxu1 %v405_v39 }
  0xe9   :  { %396 = vmatmul.mubr.msk.f32.vlgmr.msra.gmra.mrb[4].mxu0 %vm192_vm2, %v165_v40  ;;  %399 = vmatmul.mubr.msk.f32.vlgmr.msra.gmra.mrb[0].mxu1 %vm192_vm2, %v167_v41 }
 0x1bc   :  { %v397_v47 = vpop.f32.mrb[4].mxu0  ;;  %v400_v48 = vpop.f32.mrb[0].mxu1 }
 0x1bd   :  { %v277_v49 = vadd.f32 %v397_v47, %v180_v43  ;;  %v271_v50 = vpop.f32.mrb[5].mxu0  ;;  %v281_v51 = vpop.f32.mrb[1].mxu1  ;;  %v287_v52 = vadd.f32 %v400_v48, %v190_v45 }
 0x1be   :  { %v272_v53 = vadd.f32 %v271_v50, %v175_v42  ;;  %v282_v54 = vadd.f32 %v281_v51, %v185_v44 }
 0x1bf   :  { %v291_v56 = vmax.f32 %v277_v49, 0.0  ;;  %v293_v60 = vmax.f32 %v287_v52, 0.0 }
 0x1c0   :  { %v290_v57 = vmax.f32 %v272_v53, 0.0  ;;  %v292_v58 = vmax.f32 %v282_v54, 0.0 }
 0x1c1   :  { %v319_v59 = vmul.f32 %v306_v55, %v291_v56  ;;  %v321_v2 = vmul.f32 %v316_v1, %v293_v60 }
 0x1c2   :  { %v318_v61 = vmul.f32 %v301_v46, %v290_v57  ;;  %v320_v0 = vmul.f32 %v311_v62, %v292_v58 }
 0x1c4   :  { %v322_v63 = vadd.f32 %v319_v59, %v318_v61 }
 0x1c6   :  { %v323_v3 = vadd.f32 %v322_v63, %v320_v0 }
 0x1c8   :  { %v324_v5 = vadd.f32 %v323_v3, %v321_v2 }
 0x1ca   :  { %v325_v6 = vrot.slane %v324_v5, 4 }
 0x1cc   :  { %v326_v8 = vadd.f32 %v325_v6, %v324_v5 }
 0x1ce   :  { %v327_v9 = vrot.slane %v326_v8, 2 }
 0x1d0   :  { %v328_v11 = vadd.f32 %v327_v9, %v326_v8 }
 0x1d2   :  { %v329_v13 = vrot.slane %v328_v11, 1 }
 0x1d4   :  { %v330_v15 = vadd.f32 %v329_v13, %v328_v11 }
 0x1d6   :  { %v341_v16 = vadd.f32 %v340_v14, %v330_v15 }
 0x1d8   :  { %342 = vst [vmem:[#allocation3] sm:$0x1] %v341_v16 }
 0x1d9   :  { %428 = shalt.err (!%p425_p4)
}
 0x1da   :  { %s429_s19 = scalar_lea.hbm %s576_s7, 16 }
 0x1db   :  { %p430_p5 = scmp.ne.s32.totalorder %s576_s7, %s429_s19  ;;  %p433_p6 = scmp.lt.u32.totalorder %s429_s19, %s576_s7 }
 0x1dd   :  { %p435_p7 = pnand %p433_p6, %p430_p5 }
 0x1df   :  { %438 = shalt.err (!%p435_p7)
}
 0x1e0   :  { %352 = dma.vmem_to_hbm [thread:$0]  %s350_s14, 16, %s576_s7, [#allocation4]  }
 0x1e1   :  { %439 = dma.done.wait [#allocation4], 16  }
 0x1e2   :  { %440 = vsyncadd [#allocation4], 4294967280 }
 0x1e3   :  { %356 = vsyncpa [#allocation4], 1 }

</bundles_post_ra>
